<compile_context>
chip_gen: v7x
topology: tpu7x:2x2x1
jax: 0.10.0
libtpu: 0.0.40
codegen_flags: <defaults>
</compile_context>

<pallas_src>
import functools

import jax
import jax.numpy as jnp
from jax import lax
from jax.experimental import pallas as pl
from jax.experimental.pallas import tpu as pltpu


HIDDEN = 32                    # in_channels == out_channels (Identity skip)
N_INTERMEDIATE = 1             # n_intermediate_layers (shared-weight Linear applied N times)
LN_EPS = 1e-5
LANE_PACK = 128 // HIDDEN      # 4 original rows packed into the 128-lane dim
PACKED_D = HIDDEN * LANE_PACK  # 128 (lane-dense feature width)
TM_PACKED = 1024               # packed rows per tile (1024*128*4B = 512 KiB per buffer)

# PyTorch nn.GELU() default is exact erf; keep it for parity.  True swaps in the
# tanh approximation (transcendental moves to the otherwise-idle EUP slot instead
# of a long VALU erf polynomial: the biggest v6e/v7x lever) at ~1e-3 deviation.
GELU_TANH_APPROX = False

# Matmul operand dtype for the block-diagonal Linear weights.  jnp.bfloat16 is a
# v5e-specific win (native-rate MXU vs multi-pass f32 emulation) and halves the
# resident weight VMEM; f32 keeps tight parity with the PyTorch module.
MATMUL_DTYPE = jnp.float32

# Statically unroll the block loop up to this count; beyond it use lax.fori_loop
# so the live vreg set stays bounded to one block's weights.
MAX_STATIC_BLOCK_UNROLL = 4


def _gelu(x):
    if GELU_TANH_APPROX:
        c = jnp.float32(0.7978845608028654)  # sqrt(2/pi)
        return 0.5 * x * (1.0 + jnp.tanh(c * (x + 0.044715 * x * x * x)))
    inv_sqrt2 = jnp.float32(0.7071067811865476)
    return 0.5 * x * (1.0 + lax.erf(x * inv_sqrt2))


def _block_step(h, w1, b1, gamma, beta, w2, b2, ln_a):
    """One ResidualBlock1D on a (tm, 128) lane-packed tile (all operands in VMEM)."""
    x_in = h
    # entry_block: Linear -> GELU -> LayerNorm (per 32-lane segment)
    z = jnp.dot(x_in.astype(w1.dtype), w1, preferred_element_type=jnp.float32) + b1
    z = _gelu(z)
    # One-pass segmented LayerNorm statistics: E[z] and E[z^2] are two
    # independent MXU reductions against the block-diagonal averaging matrix.
    mean = jnp.dot(z, ln_a, preferred_element_type=jnp.float32)
    msq = jnp.dot(z * z, ln_a, preferred_element_type=jnp.float32)
    var = jnp.maximum(msq - mean * mean, 0.0)
    z = (z - mean) * lax.rsqrt(var + LN_EPS) * gamma + beta
    # final_block: n_intermediate shared-weight Linears pre-composed into
    # (W2_eff, b2_eff) at pack time -> single matmul here.
    z = jnp.dot(z.astype(w2.dtype), w2, preferred_element_type=jnp.float32) + b2
    # final_act + Identity skip
    return _gelu(z) + x_in


def _fused_blocks_kernel(x_ref, w1_ref, b1_ref, g_ref, beta_ref, w2_ref, b2_ref,
                         ln_a_ref, o_ref, *, n_blocks):
    """All residual blocks over one (tm, 128) lane-packed row tile, in VMEM."""
    h = x_ref[...]                                   # (tm, 128)
    ln_a = ln_a_ref[...]                             # (128, 128) averaging matrix

    def step(blk, carry):
        return _block_step(carry, w1_ref[blk], b1_ref[blk], g_ref[blk],
                           beta_ref[blk], w2_ref[blk], b2_ref[blk], ln_a)

    if n_blocks <= MAX_STATIC_BLOCK_UNROLL:
        for blk in range(n_blocks):                  # static unroll (small n_blocks)
            h = step(blk, h)
    else:
        h = lax.fori_loop(0, n_blocks, step, h)      # bounded live ranges for deep encoders

    o_ref[...] = h


def _compose_final_block(w2, b2, n_intermediate):
    """Fold `z -> z @ W2 + b2` applied n times (shared weights) into one affine map."""
    if n_intermediate <= 0:
        return jnp.eye(w2.shape[0], dtype=w2.dtype), jnp.zeros_like(b2)
    w_eff, b_eff = w2, b2
    for _ in range(n_intermediate - 1):
        w_eff = jnp.dot(w_eff, w2, precision=lax.Precision.HIGHEST)
        b_eff = jnp.dot(b_eff, w2, precision=lax.Precision.HIGHEST) + b2
    return w_eff, b_eff


def pack_bbox_encoder_params(entry_params, encoder_params_list, *,
                             n_intermediate=N_INTERMEDIATE,
                             matmul_dtype=MATMUL_DTYPE):
    """Pack per-block params into the lane-packed layout.  Call ONCE per weight
    set (hoisted out of the per-forward path)."""
    params_list = [entry_params] + list(encoder_params_list)
    eye = jnp.eye(LANE_PACK, dtype=jnp.float32)

    def block_diag(w):   # (32,32) -> block-diagonal (128,128) = kron(I4, w)
        return jnp.kron(eye, w.astype(jnp.float32))

    def per_segment(v):  # (1,32) -> (1,128), repeated once per lane segment
        return jnp.tile(v.astype(jnp.float32), (1, LANE_PACK))

    eff = [_compose_final_block(p["w2"], p["b2"], n_intermediate) for p in params_list]

    return {
        "w1": jnp.stack([block_diag(p["w1"]) for p in params_list]).astype(matmul_dtype),
        "b1": jnp.stack([per_segment(p["b1"]) for p in params_list]),
        "gamma": jnp.stack([per_segment(p["gamma"]) for p in params_list]),
        "beta": jnp.stack([per_segment(p["beta"]) for p in params_list]),
        "w2": jnp.stack([block_diag(we) for we, _ in eff]).astype(matmul_dtype),
        "b2": jnp.stack([per_segment(be) for _, be in eff]),
        # h @ lnA == per-32-lane-segment mean broadcast back across the segment.
        "lnA": jnp.kron(eye, jnp.full((HIDDEN, HIDDEN), 1.0 / HIDDEN, jnp.float32)),
    }


def _round_up(a, b):
    return ((a + b - 1) // b) * b


def _choose_tm(mp, tm_max):
    """Largest packed-row tile that amortizes grid-step overhead, capped so the
    'parallel' grid axis has >= 2 (and even) steps when there is enough work —
    v7x has 2 TensorCores; harmless on single-TC v5e/v6e."""
    full = _round_up(max(mp, 8), 8)
    tm = min(tm_max, full)
    if mp > 16:
        n = pl.cdiv(mp, tm)
        if n < 2:
            n = 2
        elif n % 2:
            n += 1
        tm = min(tm, max(8, _round_up(pl.cdiv(mp, n), 8)))
    return tm


def bbox_encoder_forward(x, packed, *, tm_packed=TM_PACKED):
    """BBoxEncoderModel: entry ResidualBlock1D + encoder blocks, fully fused.

    x: (batch, seq, HIDDEN) float32.  `packed` is the output of
    pack_bbox_encoder_params (computed once per weight set, not per call).
    """
    B, S, D = x.shape
    assert D == HIDDEN, f"expected hidden={HIDDEN}, got {D}"
    n_blocks = packed["w1"].shape[0]

    # ---- flatten + lane-pack 4 original rows into the 128-lane dimension ----
    M = B * S
    h = x.reshape(M, D).astype(jnp.float32)
    m_pad = (-M) % LANE_PACK
    if m_pad:
        h = jnp.pad(h, ((0, m_pad), (0, 0)))
    mp = h.shape[0] // LANE_PACK
    hp = h.reshape(mp, PACKED_D)                     # pure row-major reshape (free)

    # ---- row tiling: pad packed rows to a multiple of the tile ----
    tm = _choose_tm(mp, tm_packed)
    mp_pad = (-mp) % tm
    if mp_pad:
        hp = jnp.pad(hp, ((0, mp_pad), (0, 0)))
    mp_padded = hp.shape[0]
    grid = (mp_padded // tm,)

    kernel = functools.partial(_fused_blocks_kernel, n_blocks=n_blocks)

    def const_spec(arr):
        zeros = (0,) * arr.ndim
        return pl.BlockSpec(arr.shape, lambda i, _z=zeros: _z)

    out = pl.pallas_call(
        kernel,
        out_shape=jax.ShapeDtypeStruct((mp_padded, PACKED_D), jnp.float32),
        grid_spec=pltpu.PrefetchScalarGridSpec(
            num_scalar_prefetch=0,
            grid=grid,
            in_specs=[
                pl.BlockSpec((tm, PACKED_D), lambda i: (i, 0)),   # activations (tiled rows)
                const_spec(packed["w1"]),      # W1 block-diag, resident
                const_spec(packed["b1"]),
                const_spec(packed["gamma"]),
                const_spec(packed["beta"]),
                const_spec(packed["w2"]),      # composed W2^n block-diag, resident
                const_spec(packed["b2"]),
                const_spec(packed["lnA"]),     # LayerNorm segment-mean matrix
            ],
            out_specs=pl.BlockSpec((tm, PACKED_D), lambda i: (i, 0)),
        ),
        compiler_params=pltpu.CompilerParams(
            dimension_semantics=("parallel",),        # shard row tiles across TCs (v7x)
            vmem_limit_bytes=32 * 1024 * 1024,        # safe on v5e/v6e/v7x; footprint ~3 MiB
        ),
    )(hp, packed["w1"], packed["b1"], packed["gamma"], packed["beta"],
      packed["w2"], packed["b2"], packed["lnA"])

    # ---- unpack: drop tile padding, un-pack lanes, drop row padding ----
    out = out[:mp].reshape(mp * LANE_PACK, D)[:M]
    return out.reshape(B, S, D)


def init_block_params(key, d_in, d_out):
    """Deterministic parameter init mimicking PyTorch Linear defaults (uniform)."""
    k1, k2, k3, k4 = jax.random.split(key, 4)
    lim1 = 1.0 / jnp.sqrt(d_in)
    lim2 = 1.0 / jnp.sqrt(d_out)
    return {
        "w1": jax.random.uniform(k1, (d_in, d_out), jnp.float32, -lim1, lim1),
        "b1": jax.random.uniform(k2, (1, d_out), jnp.float32, -lim1, lim1),
        "gamma": jnp.ones((1, d_out), jnp.float32),
        "beta": jnp.zeros((1, d_out), jnp.float32),
        "w2": jax.random.uniform(k3, (d_out, d_out), jnp.float32, -lim2, lim2),
        "b2": jax.random.uniform(k4, (1, d_out), jnp.float32, -lim2, lim2),
    }


# Pure-JAX reference: literal ResidualBlock1D math (unpacked layout, explicit
# n_intermediate loop, two-pass LayerNorm, f32-precision matmuls).
def _ref_block(x2d, p, n_intermediate=N_INTERMEDIATE):
    hi = lax.Precision.HIGHEST
    h = _gelu(jnp.dot(x2d, p["w1"], precision=hi) + p["b1"])
    mean = jnp.mean(h, axis=-1, keepdims=True)
    var = jnp.mean((h - mean) ** 2, axis=-1, keepdims=True)
    h = (h - mean) * lax.rsqrt(var + LN_EPS) * p["gamma"] + p["beta"]
    for _ in range(n_intermediate):
        h = jnp.dot(h, p["w2"], precision=hi) + p["b2"]
    return _gelu(h) + x2d


if __name__ == "__main__":
    key = jax.random.PRNGKey(0)
    k_x, k_entry, k_enc = jax.random.split(key, 3)

    B, S, D = 2, 8, HIDDEN
    x = jax.random.normal(k_x, (B, S, D), jnp.float32)

    entry_params = init_block_params(k_entry, D, D)
    encoder_params = [init_block_params(k_enc, D, D)]

    # Weight packing hoisted out of the per-call path: done once here.
    packed = pack_bbox_encoder_params(entry_params, encoder_params)
    fwd = jax.jit(bbox_encoder_forward)

    out = jax.block_until_ready(fwd(x, packed))

    # Correctness check against the plain-JAX reference of the literal module math.
    ref = x.reshape(B * S, D)
    ref = _ref_block(ref, entry_params)
    for p in encoder_params:
        ref = _ref_block(ref, p)
    ref = ref.reshape(B, S, D)

    max_err = float(jnp.max(jnp.abs(out - ref)))
    assert jnp.allclose(out, ref, atol=1e-4, rtol=1e-4), (
        f"mismatch vs reference (max abs err {max_err:.3e})")

    print("KERNEL_OK")
</pallas_src>

<mosaic_0001>
module attributes {stable_mosaic.version = 11 : i64} {
  func.func @_fused_blocks_kernel(%arg0: i32, %arg1: memref<8x128xf32, #tpu.memory_space<vmem>>, %arg2: memref<2x128x128xf32, #tpu.memory_space<vmem>>, %arg3: memref<2x1x128xf32, #tpu.memory_space<vmem>>, %arg4: memref<2x1x128xf32, #tpu.memory_space<vmem>>, %arg5: memref<2x1x128xf32, #tpu.memory_space<vmem>>, %arg6: memref<2x128x128xf32, #tpu.memory_space<vmem>>, %arg7: memref<2x1x128xf32, #tpu.memory_space<vmem>>, %arg8: memref<128x128xf32, #tpu.memory_space<vmem>>, %arg9: memref<8x128xf32, #tpu.memory_space<vmem>>) attributes {dimension_semantics = [#tpu.dimension_semantics<parallel>], iteration_bounds = array<i64: 1>, scalar_prefetch = 0 : i64, scratch_operands = 0 : i64, tpu.core_type = #tpu.core_type<tc>, window_params = [{transform_indices = @transform_0, window_bounds = array<i64: 8, 128>}, {pipeline_mode = #tpu.pipeline_mode<synchronous>, transform_indices = @transform_1, window_bounds = array<i64: 2, 128, 128>}, {pipeline_mode = #tpu.pipeline_mode<synchronous>, transform_indices = @transform_2, window_bounds = array<i64: 2, 1, 128>}, {pipeline_mode = #tpu.pipeline_mode<synchronous>, transform_indices = @transform_3, window_bounds = array<i64: 2, 1, 128>}, {pipeline_mode = #tpu.pipeline_mode<synchronous>, transform_indices = @transform_4, window_bounds = array<i64: 2, 1, 128>}, {pipeline_mode = #tpu.pipeline_mode<synchronous>, transform_indices = @transform_5, window_bounds = array<i64: 2, 128, 128>}, {pipeline_mode = #tpu.pipeline_mode<synchronous>, transform_indices = @transform_6, window_bounds = array<i64: 2, 1, 128>}, {pipeline_mode = #tpu.pipeline_mode<synchronous>, transform_indices = @transform_7, window_bounds = array<i64: 128, 128>}, {transform_indices = @transform_8, window_bounds = array<i64: 8, 128>}]} {
    %c0 = arith.constant 0 : index
    %c0_0 = arith.constant 0 : index
    %0 = vector.load %arg1[%c0, %c0_0] : memref<8x128xf32, #tpu.memory_space<vmem>>, vector<8x128xf32>
    %c0_1 = arith.constant 0 : index
    %c0_2 = arith.constant 0 : index
    %1 = vector.load %arg8[%c0_1, %c0_2] : memref<128x128xf32, #tpu.memory_space<vmem>>, vector<128x128xf32>
    %c0_3 = arith.constant 0 : index
    %c0_4 = arith.constant 0 : index
    %c0_5 = arith.constant 0 : index
    %2 = vector.load %arg2[%c0_3, %c0_4, %c0_5] : memref<2x128x128xf32, #tpu.memory_space<vmem>>, vector<1x128x128xf32>
    %3 = vector.shape_cast %2 : vector<1x128x128xf32> to vector<128x128xf32>
    %c0_6 = arith.constant 0 : index
    %c0_7 = arith.constant 0 : index
    %c0_8 = arith.constant 0 : index
    %4 = vector.load %arg3[%c0_6, %c0_7, %c0_8] : memref<2x1x128xf32, #tpu.memory_space<vmem>>, vector<1x1x128xf32>
    %5 = vector.shape_cast %4 : vector<1x1x128xf32> to vector<1x128xf32>
    %c0_9 = arith.constant 0 : index
    %c0_10 = arith.constant 0 : index
    %c0_11 = arith.constant 0 : index
    %6 = vector.load %arg4[%c0_9, %c0_10, %c0_11] : memref<2x1x128xf32, #tpu.memory_space<vmem>>, vector<1x1x128xf32>
    %7 = vector.shape_cast %6 : vector<1x1x128xf32> to vector<1x128xf32>
    %c0_12 = arith.constant 0 : index
    %c0_13 = arith.constant 0 : index
    %c0_14 = arith.constant 0 : index
    %8 = vector.load %arg5[%c0_12, %c0_13, %c0_14] : memref<2x1x128xf32, #tpu.memory_space<vmem>>, vector<1x1x128xf32>
    %9 = vector.shape_cast %8 : vector<1x1x128xf32> to vector<1x128xf32>
    %c0_15 = arith.constant 0 : index
    %c0_16 = arith.constant 0 : index
    %c0_17 = arith.constant 0 : index
    %10 = vector.load %arg6[%c0_15, %c0_16, %c0_17] : memref<2x128x128xf32, #tpu.memory_space<vmem>>, vector<1x128x128xf32>
    %11 = vector.shape_cast %10 : vector<1x128x128xf32> to vector<128x128xf32>
    %c0_18 = arith.constant 0 : index
    %c0_19 = arith.constant 0 : index
    %c0_20 = arith.constant 0 : index
    %12 = vector.load %arg7[%c0_18, %c0_19, %c0_20] : memref<2x1x128xf32, #tpu.memory_space<vmem>>, vector<1x1x128xf32>
    %13 = vector.shape_cast %12 : vector<1x1x128xf32> to vector<1x128xf32>
    %cst = arith.constant dense<0.000000e+00> : vector<8x128xf32>
    %14 = tpu.matmul %0, %3, %cst {dimension_numbers = #tpu.dot_dimension_numbers<[1], [0], [0], [1], [0, 0, 1, 1], [], []>} : vector<8x128xf32>, vector<128x128xf32>, vector<8x128xf32> -> vector<8x128xf32>
    %15 = vector.broadcast %5 : vector<1x128xf32> to vector<8x128xf32>
    %16 = arith.addf %14, %15 : vector<8x128xf32>
    %cst_21 = arith.constant 5.000000e-01 : f32
    %17 = vector.broadcast %cst_21 : f32 to vector<8x128xf32>
    %18 = arith.mulf %17, %16 : vector<8x128xf32>
    %cst_22 = arith.constant 0.707106769 : f32
    %19 = vector.broadcast %cst_22 : f32 to vector<8x128xf32>
    %20 = arith.mulf %16, %19 : vector<8x128xf32>
    %21 = math.erf %20 : vector<8x128xf32>
    %cst_23 = arith.constant 1.000000e+00 : f32
    %22 = vector.broadcast %cst_23 : f32 to vector<8x128xf32>
    %23 = arith.addf %22, %21 : vector<8x128xf32>
    %24 = arith.mulf %18, %23 : vector<8x128xf32>
    %cst_24 = arith.constant dense<0.000000e+00> : vector<8x128xf32>
    %25 = tpu.matmul %24, %1, %cst_24 {dimension_numbers = #tpu.dot_dimension_numbers<[1], [0], [0], [1], [0, 0, 1, 1], [], []>} : vector<8x128xf32>, vector<128x128xf32>, vector<8x128xf32> -> vector<8x128xf32>
    %26 = arith.mulf %24, %24 : vector<8x128xf32>
    %cst_25 = arith.constant dense<0.000000e+00> : vector<8x128xf32>
    %27 = tpu.matmul %26, %1, %cst_25 {dimension_numbers = #tpu.dot_dimension_numbers<[1], [0], [0], [1], [0, 0, 1, 1], [], []>} : vector<8x128xf32>, vector<128x128xf32>, vector<8x128xf32> -> vector<8x128xf32>
    %28 = arith.mulf %25, %25 : vector<8x128xf32>
    %29 = arith.subf %27, %28 : vector<8x128xf32>
    %cst_26 = arith.constant 0.000000e+00 : f32
    %30 = vector.broadcast %cst_26 : f32 to vector<8x128xf32>
    %31 = arith.maximumf %29, %30 : vector<8x128xf32>
    %32 = arith.subf %24, %25 : vector<8x128xf32>
    %cst_27 = arith.constant 9.99999974E-6 : f32
    %33 = vector.broadcast %cst_27 : f32 to vector<8x128xf32>
    %34 = arith.addf %31, %33 : vector<8x128xf32>
    %35 = math.rsqrt %34 : vector<8x128xf32>
    %36 = arith.mulf %32, %35 : vector<8x128xf32>
    %37 = vector.broadcast %7 : vector<1x128xf32> to vector<8x128xf32>
    %38 = arith.mulf %36, %37 : vector<8x128xf32>
    %39 = vector.broadcast %9 : vector<1x128xf32> to vector<8x128xf32>
    %40 = arith.addf %38, %39 : vector<8x128xf32>
    %cst_28 = arith.constant dense<0.000000e+00> : vector<8x128xf32>
    %41 = tpu.matmul %40, %11, %cst_28 {dimension_numbers = #tpu.dot_dimension_numbers<[1], [0], [0], [1], [0, 0, 1, 1], [], []>} : vector<8x128xf32>, vector<128x128xf32>, vector<8x128xf32> -> vector<8x128xf32>
    %42 = vector.broadcast %13 : vector<1x128xf32> to vector<8x128xf32>
    %43 = arith.addf %41, %42 : vector<8x128xf32>
    %cst_29 = arith.constant 5.000000e-01 : f32
    %44 = vector.broadcast %cst_29 : f32 to vector<8x128xf32>
    %45 = arith.mulf %44, %43 : vector<8x128xf32>
    %cst_30 = arith.constant 0.707106769 : f32
    %46 = vector.broadcast %cst_30 : f32 to vector<8x128xf32>
    %47 = arith.mulf %43, %46 : vector<8x128xf32>
    %48 = math.erf %47 : vector<8x128xf32>
    %cst_31 = arith.constant 1.000000e+00 : f32
    %49 = vector.broadcast %cst_31 : f32 to vector<8x128xf32>
    %50 = arith.addf %49, %48 : vector<8x128xf32>
    %51 = arith.mulf %45, %50 : vector<8x128xf32>
    %52 = arith.addf %51, %0 : vector<8x128xf32>
    %c1 = arith.constant 1 : index
    %c0_32 = arith.constant 0 : index
    %c0_33 = arith.constant 0 : index
    %53 = vector.load %arg2[%c1, %c0_32, %c0_33] : memref<2x128x128xf32, #tpu.memory_space<vmem>>, vector<1x128x128xf32>
    %54 = vector.shape_cast %53 : vector<1x128x128xf32> to vector<128x128xf32>
    %c1_34 = arith.constant 1 : index
    %c0_35 = arith.constant 0 : index
    %c0_36 = arith.constant 0 : index
    %55 = vector.load %arg3[%c1_34, %c0_35, %c0_36] : memref<2x1x128xf32, #tpu.memory_space<vmem>>, vector<1x1x128xf32>
    %56 = vector.shape_cast %55 : vector<1x1x128xf32> to vector<1x128xf32>
    %c1_37 = arith.constant 1 : index
    %c0_38 = arith.constant 0 : index
    %c0_39 = arith.constant 0 : index
    %57 = vector.load %arg4[%c1_37, %c0_38, %c0_39] : memref<2x1x128xf32, #tpu.memory_space<vmem>>, vector<1x1x128xf32>
    %58 = vector.shape_cast %57 : vector<1x1x128xf32> to vector<1x128xf32>
    %c1_40 = arith.constant 1 : index
    %c0_41 = arith.constant 0 : index
    %c0_42 = arith.constant 0 : index
    %59 = vector.load %arg5[%c1_40, %c0_41, %c0_42] : memref<2x1x128xf32, #tpu.memory_space<vmem>>, vector<1x1x128xf32>
    %60 = vector.shape_cast %59 : vector<1x1x128xf32> to vector<1x128xf32>
    %c1_43 = arith.constant 1 : index
    %c0_44 = arith.constant 0 : index
    %c0_45 = arith.constant 0 : index
    %61 = vector.load %arg6[%c1_43, %c0_44, %c0_45] : memref<2x128x128xf32, #tpu.memory_space<vmem>>, vector<1x128x128xf32>
    %62 = vector.shape_cast %61 : vector<1x128x128xf32> to vector<128x128xf32>
    %c1_46 = arith.constant 1 : index
    %c0_47 = arith.constant 0 : index
    %c0_48 = arith.constant 0 : index
    %63 = vector.load %arg7[%c1_46, %c0_47, %c0_48] : memref<2x1x128xf32, #tpu.memory_space<vmem>>, vector<1x1x128xf32>
    %64 = vector.shape_cast %63 : vector<1x1x128xf32> to vector<1x128xf32>
    %cst_49 = arith.constant dense<0.000000e+00> : vector<8x128xf32>
    %65 = tpu.matmul %52, %54, %cst_49 {dimension_numbers = #tpu.dot_dimension_numbers<[1], [0], [0], [1], [0, 0, 1, 1], [], []>} : vector<8x128xf32>, vector<128x128xf32>, vector<8x128xf32> -> vector<8x128xf32>
    %66 = vector.broadcast %56 : vector<1x128xf32> to vector<8x128xf32>
    %67 = arith.addf %65, %66 : vector<8x128xf32>
    %cst_50 = arith.constant 5.000000e-01 : f32
    %68 = vector.broadcast %cst_50 : f32 to vector<8x128xf32>
    %69 = arith.mulf %68, %67 : vector<8x128xf32>
    %cst_51 = arith.constant 0.707106769 : f32
    %70 = vector.broadcast %cst_51 : f32 to vector<8x128xf32>
    %71 = arith.mulf %67, %70 : vector<8x128xf32>
    %72 = math.erf %71 : vector<8x128xf32>
    %cst_52 = arith.constant 1.000000e+00 : f32
    %73 = vector.broadcast %cst_52 : f32 to vector<8x128xf32>
    %74 = arith.addf %73, %72 : vector<8x128xf32>
    %75 = arith.mulf %69, %74 : vector<8x128xf32>
    %cst_53 = arith.constant dense<0.000000e+00> : vector<8x128xf32>
    %76 = tpu.matmul %75, %1, %cst_53 {dimension_numbers = #tpu.dot_dimension_numbers<[1], [0], [0], [1], [0, 0, 1, 1], [], []>} : vector<8x128xf32>, vector<128x128xf32>, vector<8x128xf32> -> vector<8x128xf32>
    %77 = arith.mulf %75, %75 : vector<8x128xf32>
    %cst_54 = arith.constant dense<0.000000e+00> : vector<8x128xf32>
    %78 = tpu.matmul %77, %1, %cst_54 {dimension_numbers = #tpu.dot_dimension_numbers<[1], [0], [0], [1], [0, 0, 1, 1], [], []>} : vector<8x128xf32>, vector<128x128xf32>, vector<8x128xf32> -> vector<8x128xf32>
    %79 = arith.mulf %76, %76 : vector<8x128xf32>
    %80 = arith.subf %78, %79 : vector<8x128xf32>
    %cst_55 = arith.constant 0.000000e+00 : f32
    %81 = vector.broadcast %cst_55 : f32 to vector<8x128xf32>
    %82 = arith.maximumf %80, %81 : vector<8x128xf32>
    %83 = arith.subf %75, %76 : vector<8x128xf32>
    %cst_56 = arith.constant 9.99999974E-6 : f32
    %84 = vector.broadcast %cst_56 : f32 to vector<8x128xf32>
    %85 = arith.addf %82, %84 : vector<8x128xf32>
    %86 = math.rsqrt %85 : vector<8x128xf32>
    %87 = arith.mulf %83, %86 : vector<8x128xf32>
    %88 = vector.broadcast %58 : vector<1x128xf32> to vector<8x128xf32>
    %89 = arith.mulf %87, %88 : vector<8x128xf32>
    %90 = vector.broadcast %60 : vector<1x128xf32> to vector<8x128xf32>
    %91 = arith.addf %89, %90 : vector<8x128xf32>
    %cst_57 = arith.constant dense<0.000000e+00> : vector<8x128xf32>
    %92 = tpu.matmul %91, %62, %cst_57 {dimension_numbers = #tpu.dot_dimension_numbers<[1], [0], [0], [1], [0, 0, 1, 1], [], []>} : vector<8x128xf32>, vector<128x128xf32>, vector<8x128xf32> -> vector<8x128xf32>
    %93 = vector.broadcast %64 : vector<1x128xf32> to vector<8x128xf32>
    %94 = arith.addf %92, %93 : vector<8x128xf32>
    %cst_58 = arith.constant 5.000000e-01 : f32
    %95 = vector.broadcast %cst_58 : f32 to vector<8x128xf32>
    %96 = arith.mulf %95, %94 : vector<8x128xf32>
    %cst_59 = arith.constant 0.707106769 : f32
    %97 = vector.broadcast %cst_59 : f32 to vector<8x128xf32>
    %98 = arith.mulf %94, %97 : vector<8x128xf32>
    %99 = math.erf %98 : vector<8x128xf32>
    %cst_60 = arith.constant 1.000000e+00 : f32
    %100 = vector.broadcast %cst_60 : f32 to vector<8x128xf32>
    %101 = arith.addf %100, %99 : vector<8x128xf32>
    %102 = arith.mulf %96, %101 : vector<8x128xf32>
    %103 = arith.addf %102, %52 : vector<8x128xf32>
    %c0_61 = arith.constant 0 : index
    %c0_62 = arith.constant 0 : index
    %104 = vector.load %arg9[%c0_61, %c0_62] : memref<8x128xf32, #tpu.memory_space<vmem>>, vector<8x128xf32>
    tpu.vector_store %arg9[%c0_61, %c0_62], %103 {strides = array<i32>} : memref<8x128xf32, #tpu.memory_space<vmem>>, vector<8x128xf32>,
    return
  }
  func.func @transform_0(%arg0: i32) -> (i32, i32) {
    %c0_i32 = arith.constant 0 : i32
    %c0_i32_0 = arith.constant 0 : i32
    return %arg0, %c0_i32 : i32, i32
  }
  func.func @transform_1(%arg0: i32) -> (i32, i32, i32) {
    %c0_i32 = arith.constant 0 : i32
    %c0_i32_0 = arith.constant 0 : i32
    %c0_i32_1 = arith.constant 0 : i32
    %c0_i32_2 = arith.constant 0 : i32
    return %c0_i32, %c0_i32_0, %c0_i32_1 : i32, i32, i32
  }
  func.func @transform_2(%arg0: i32) -> (i32, i32, i32) {
    %c0_i32 = arith.constant 0 : i32
    %c0_i32_0 = arith.constant 0 : i32
    %c0_i32_1 = arith.constant 0 : i32
    %c0_i32_2 = arith.constant 0 : i32
    return %c0_i32, %c0_i32_0, %c0_i32_1 : i32, i32, i32
  }
  func.func @transform_3(%arg0: i32) -> (i32, i32, i32) {
    %c0_i32 = arith.constant 0 : i32
    %c0_i32_0 = arith.constant 0 : i32
    %c0_i32_1 = arith.constant 0 : i32
    %c0_i32_2 = arith.constant 0 : i32
    return %c0_i32, %c0_i32_0, %c0_i32_1 : i32, i32, i32
  }
  func.func @transform_4(%arg0: i32) -> (i32, i32, i32) {
    %c0_i32 = arith.constant 0 : i32
    %c0_i32_0 = arith.constant 0 : i32
    %c0_i32_1 = arith.constant 0 : i32
    %c0_i32_2 = arith.constant 0 : i32
    return %c0_i32, %c0_i32_0, %c0_i32_1 : i32, i32, i32
  }
  func.func @transform_5(%arg0: i32) -> (i32, i32, i32) {
    %c0_i32 = arith.constant 0 : i32
    %c0_i32_0 = arith.constant 0 : i32
    %c0_i32_1 = arith.constant 0 : i32
    %c0_i32_2 = arith.constant 0 : i32
    return %c0_i32, %c0_i32_0, %c0_i32_1 : i32, i32, i32
  }
  func.func @transform_6(%arg0: i32) -> (i32, i32, i32) {
    %c0_i32 = arith.constant 0 : i32
    %c0_i32_0 = arith.constant 0 : i32
    %c0_i32_1 = arith.constant 0 : i32
    %c0_i32_2 = arith.constant 0 : i32
    return %c0_i32, %c0_i32_0, %c0_i32_1 : i32, i32, i32
  }
  func.func @transform_7(%arg0: i32) -> (i32, i32) {
    %c0_i32 = arith.constant 0 : i32
    %c0_i32_0 = arith.constant 0 : i32
    %c0_i32_1 = arith.constant 0 : i32
    return %c0_i32, %c0_i32_0 : i32, i32
  }
  func.func @transform_8(%arg0: i32) -> (i32, i32) {
    %c0_i32 = arith.constant 0 : i32
    %c0_i32_0 = arith.constant 0 : i32
    return %arg0, %c0_i32 : i32, i32
  }
}

</mosaic_0001>

<bundles_post_ra>
// kernel: bbox_encoder_forward.1
= control target key start
LH: loop header
LB: loop body
LE: loop exit
PB: predicated region body
PF: predicated region fallthrough
CT: control target
= control target key end

     0   :  { %13 = vsyncpa [#allocation3], 0  ;;  %s1809_s0 = inlined_call_operand.vmem [shape: f32[8,128], index: 0, kind: input, shape index: {}]   ;;  %s1810_s1 = inlined_call_operand.hbm [shape: f32[2,128,128], index: 1, kind: input, shape index: {}]   ;;  %s1811_s2 = inlined_call_operand.vmem [shape: f32[2,1,128], index: 2, kind: input, shape index: {}]   ;;  %s1812_s3 = inlined_call_operand.vmem [shape: f32[2,1,128], index: 3, kind: input, shape index: {}]   ;;  %s1813_s4 = inlined_call_operand.vmem [shape: f32[2,1,128], index: 4, kind: input, shape index: {}]   ;;  %s1814_s5 = inlined_call_operand.hbm [shape: f32[2,128,128], index: 5, kind: input, shape index: {}]   ;;  %s1815_s6 = inlined_call_operand.vmem [shape: f32[2,1,128], index: 6, kind: input, shape index: {}]   ;;  %s1816_s7 = inlined_call_operand.hbm [shape: f32[128,128], index: 7, kind: input, shape index: {}]   ;;  %s1817_s8 = inlined_call_operand.vmem [shape: f32[8,128], index: 8, kind: output, shape index: {}]  }
   0x1   :  { %14 = vsyncpa [#allocation5], 0  ;;  %s1532_s27 = smov [#allocation4]   ;;  %s1533_s29 = smov [#allocation2]  }
   0x2   :  { %s40_s28 = sshll.u32 %s1532_s27, 4  ;;  %s22_s30 = sshll.u32 %s1533_s29, 4  ;;  %s41_s28 = int_to_ptr.vmem [resolvable:$true] %s40_s28  ;;  %s1585_s30 = int_to_ptr.vmem [resolvable:$true] %s22_s30 }
   0x3   :  { %s1462_s11 = scalar_lea.hbm %s1814_s5, 4096 }
   0x4   :  { %p1463_p0 = scmp.ne.s32.totalorder %s1814_s5, %s1462_s11  ;;  %p1466_p1 = scmp.lt.u32.totalorder %s1462_s11, %s1814_s5 }
   0x6   :  { %p1468_p2 = pnand %p1466_p1, %p1463_p0 }
   0x8   :  { %1471 = shalt.err (!%p1468_p2)
}
   0x9   :  { %s1472_s16 = scalar_lea.vmem %s41_s28, 4096  ;;  %p1477_p4 = scmp.lt.s32.totalorder %s41_s28, %s41_s28 }
   0xa   :  { %p1473_p3 = scmp.ne.s32.totalorder %s41_s28, %s1472_s16  ;;  %p1478_p5 = scmp.lt.s32.totalorder %s1472_s16, %s1472_s16 }
   0xc   :  { %p1479_p6 = por %p1478_p5, %p1477_p4 }
   0xe   :  { %p1480_p7 = pnand %p1479_p6, %p1473_p3 }
  0x10   :  { %1483 = shalt.err (!%p1480_p7)
}
  0x11   :  { %s1534_s17 = smov 128   ;;  %s1535_s18 = smov 8  }
  0x12   :  { %46 = dma.hbm_to_vmem [thread:$0]  %s1814_s5, 4096, %s41_s28, [#allocation5], %s1534_s17, %s1534_s17, %s1535_s18  }
  0x13   :  { %s1484_s23 = scalar_lea.hbm %s1810_s1, 4096 }
  0x14   :  { %p1485_p8 = scmp.ne.s32.totalorder %s1810_s1, %s1484_s23  ;;  %p1488_p9 = scmp.lt.u32.totalorder %s1484_s23, %s1810_s1 }
  0x16   :  { %p1490_p10 = pnand %p1488_p9, %p1485_p8 }
  0x18   :  { %1493 = shalt.err (!%p1490_p10)
}
  0x19   :  { %s1494_s29 = scalar_lea.vmem %s1585_s30, 4096  ;;  %p1499_p12 = scmp.lt.s32.totalorder %s1585_s30, %s1585_s30 }
  0x1a   :  { %p1495_p11 = scmp.ne.s32.totalorder %s1585_s30, %s1494_s29  ;;  %p1500_p13 = scmp.lt.s32.totalorder %s1494_s29, %s1494_s29 }
  0x1c   :  { %p1501_p0 = por %p1500_p13, %p1499_p12 }
  0x1e   :  { %p1502_p1 = pnand %p1501_p0, %p1495_p11 }
  0x20   :  { %1505 = shalt.err (!%p1502_p1)
}
  0x21   :  { %28 = dma.hbm_to_vmem [thread:$0]  %s1810_s1, 4096, %s1585_s30, [#allocation3], %s1534_s17, %s1534_s17, %s1535_s18  }
  0x22   :  { %s1536_s9 = smov [#allocation6]   ;;  %s1506_s13 = scalar_lea.hbm %s1816_s7, 2048 }
  0x23   :  { %s54_s10 = sshll.u32 %s1536_s9, 4  ;;  %p1507_p2 = scmp.ne.s32.totalorder %s1816_s7, %s1506_s13  ;;  %s55_s10 = int_to_ptr.vmem [resolvable:$true] %s54_s10 }
  0x24   :  { %p1510_p3 = scmp.lt.u32.totalorder %s1506_s13, %s1816_s7 }
  0x26   :  { %p1512_p4 = pnand %p1510_p3, %p1507_p2 }
  0x28   :  { %1515 = shalt.err (!%p1512_p4)
}
  0x29   :  { %s1516_s20 = scalar_lea.vmem %s55_s10, 2048  ;;  %p1521_p6 = scmp.lt.s32.totalorder %s55_s10, %s55_s10 }
  0x2a   :  { %p1517_p5 = scmp.ne.s32.totalorder %s55_s10, %s1516_s20  ;;  %p1522_p7 = scmp.lt.s32.totalorder %s1516_s20, %s1516_s20 }
  0x2c   :  { %p1523_p8 = por %p1522_p7, %p1521_p6 }
  0x2e   :  { %p1524_p9 = pnand %p1523_p8, %p1517_p5 }
  0x30   :  { %1527 = shalt.err (!%p1524_p9)
}
  0x31   :  { %60 = dma.hbm_to_vmem [thread:$0]  %s1816_s7, 2048, %s55_s10, [#allocation5], %s1534_s17, %s1534_s17, %s1535_s18  }
  0x32   :  { %1528 = dma.done.wait [#allocation3], 4096  }
  0x33   :  { %1529 = vsyncadd [#allocation3], 4294963200 }
  0x34   :  { %1530 = dma.done.wait [#allocation5], 6144  }
  0x35   :  { %1531 = vsyncadd [#allocation5], 4294961152  ;;  %v1537_v0 = vmov 0.0|0.0   ;;  %vm1538_vm0 = vmmov 0   ;;  %v1539_v1 = vmov 0.0   ;;  %v87_v2 = vld [vmem:[#allocation2] sm:$0xff] }
  0x36   :  { %1250 = vmatprep.subr.bf16.mxu0 %v1537_v0  ;;  %1002 = vmatprep.mubr.msk.f32.mxu0 %vm1538_vm0, %v1539_v1  ;;  %v88_v3 = vld [vmem:[#allocation2 + $0x8] sm:$0xff]  ;;  %v89_v4 = vld [vmem:[#allocation2 + $0x10] sm:$0xff]  ;;  %v90_v6 = vld [vmem:[#allocation2 + $0x18] sm:$0xff] }
  0x37   :  { %1274 = vmatprep.subr.bf16.mxu1 %v1537_v0  ;;  %1037 = vmatprep.mubr.msk.f32.mxu1 %vm1538_vm0, %v1539_v1  ;;  %v1251_v5 = vpack.c.bf16 %v88_v3, %v87_v2  ;;  %v1254_v7 = vpack.c.bf16 %v90_v6, %v89_v4  ;;  %v91_v8 = vld [vmem:[#allocation2 + $0x20] sm:$0xff]  ;;  %v92_v9 = vld [vmem:[#allocation2 + $0x28] sm:$0xff]  ;;  %v73_v12 = vld [vmem:[#allocation6 + $0x10] sm:$0xff] }
  0x38   :  { %v71_v10 = vld [vmem:[#allocation6] sm:$0xff]  ;;  %v72_v11 = vld [vmem:[#allocation6 + $0x8] sm:$0xff]  ;;  %v74_v13 = vld [vmem:[#allocation6 + $0x18] sm:$0xff]  ;;  %v1257_v14 = vpack.c.bf16 %v92_v9, %v91_v8 }
  0x39   :  { %1252 = vmatpush3.bf16.msra.mxu0 %v1251_v5  ;;  %v1644_v15 = vpack.c.bf16 %v72_v11, %v71_v10  ;;  %v93_v16 = vld [vmem:[#allocation2 + $0x30] sm:$0xff]  ;;  %v94_v17 = vld [vmem:[#allocation2 + $0x38] sm:$0xff]  ;;  %v1648_v18 = vpack.c.bf16 %v74_v13, %v73_v12  ;;  %v75_v19 = vld [vmem:[#allocation6 + $0x20] sm:$0xff] }
  0x3a   :  { %1253 = vmatprep.subr.bf16.mxu0 %v1537_v0  ;;  %v76_v20 = vld [vmem:[#allocation6 + $0x28] sm:$0xff]  ;;  %v1260_v21 = vpack.c.bf16 %v94_v17, %v93_v16  ;;  %v95_v22 = vld [vmem:[#allocation2 + $0x40] sm:$0xff]  ;;  %v97_v26 = vld [vmem:[#allocation2 + $0x50] sm:$0xff] }
  0x3b   :  { %1276 = vmatpush3.bf16.msra.mxu1 %v1644_v15  ;;  %v96_v23 = vld [vmem:[#allocation2 + $0x48] sm:$0xff]  ;;  %v1653_v24 = vpack.c.bf16 %v76_v20, %v75_v19  ;;  %v98_v27 = vld [vmem:[#allocation2 + $0x58] sm:$0xff]  ;;  %v99_v29 = vld [vmem:[#allocation2 + $0x60] sm:$0xff] }
  0x3c   :  { %1277 = vmatprep.subr.bf16.mxu1 %v1537_v0  ;;  %v1263_v25 = vpack.c.bf16 %v96_v23, %v95_v22  ;;  %v1266_v28 = vpack.c.bf16 %v98_v27, %v97_v26  ;;  %v100_v30 = vld [vmem:[#allocation2 + $0x68] sm:$0xff]  ;;  %v101_v32 = vld [vmem:[#allocation2 + $0x70] sm:$0xff]  ;;  %v102_v33 = vld [vmem:[#allocation2 + $0x78] sm:$0xff] }
  0x3d   :  { %1255 = vmatpush3.bf16.msra.mxu0 %v1254_v7  ;;  %v1269_v31 = vpack.c.bf16 %v100_v30, %v99_v29  ;;  %v1272_v34 = vpack.c.bf16 %v102_v33, %v101_v32  ;;  %v1665_v35 = vld [vmem:[%s1809_s0] sm:$0xff]  ;;  %v77_v36 = vld [vmem:[#allocation6 + $0x30] sm:$0xff]  ;;  %v78_v37 = vld [vmem:[#allocation6 + $0x38] sm:$0xff] }
  0x3e   :  { %1256 = vmatprep.subr.bf16.mxu0 %v1537_v0  ;;  %v1677_v38 = vpack.c.bf16 %v78_v37, %v77_v36  ;;  %v79_v39 = vld [vmem:[#allocation6 + $0x40] sm:$0xff]  ;;  %v80_v40 = vld [vmem:[#allocation6 + $0x48] sm:$0xff]  ;;  %v81_v42 = vld [vmem:[#allocation6 + $0x50] sm:$0xff] }
  0x3f   :  { %1279 = vmatpush3.bf16.msra.mxu1 %v1648_v18  ;;  %v1683_v41 = vpack.c.bf16 %v80_v40, %v79_v39  ;;  %v82_v43 = vld [vmem:[#allocation6 + $0x58] sm:$0xff]  ;;  %v83_v45 = vld [vmem:[#allocation6 + $0x60] sm:$0xff]  ;;  %v84_v46 = vld [vmem:[#allocation6 + $0x68] sm:$0xff] }
  0x40   :  { %1280 = vmatprep.subr.bf16.mxu1 %v1537_v0  ;;  %v1689_v44 = vpack.c.bf16 %v82_v43, %v81_v42  ;;  %v1695_v47 = vpack.c.bf16 %v84_v46, %v83_v45  ;;  %v85_v48 = vld [vmem:[#allocation6 + $0x70] sm:$0xff]  ;;  %v86_v49 = vld [vmem:[#allocation6 + $0x78] sm:$0xff]  ;;  %v822_v51 = vld [vmem:[%s1811_s2] ss:$0 sm:$0xff] }
  0x41   :  { %1258 = vmatpush3.bf16.msra.mxu0 %v1257_v14  ;;  %v1701_v50 = vpack.c.bf16 %v86_v49, %v85_v48  ;;  %v106_v56 = vld [vmem:[#allocation4] sm:$0xff]  ;;  %v107_v57 = vld [vmem:[#allocation4 + $0x8] sm:$0xff]  ;;  %v108_v63 = vld [vmem:[#allocation4 + $0x10] sm:$0xff] }
  0x42   :  { %1259 = vmatprep.subr.bf16.mxu0 %v1537_v0  ;;  %v1323_v61 = vpack.c.bf16 %v107_v57, %v106_v56  ;;  %v109_v2 = vld [vmem:[#allocation4 + $0x18] sm:$0xff]  ;;  %v110_v5 = vld [vmem:[#allocation4 + $0x20] sm:$0xff]  ;;  %v111_v6 = vld [vmem:[#allocation4 + $0x28] sm:$0xff] }
  0x43   :  { %1282 = vmatpush3.bf16.msra.mxu1 %v1653_v24  ;;  %v1326_v4 = vpack.c.bf16 %v109_v2, %v108_v63  ;;  %v1329_v7 = vpack.c.bf16 %v111_v6, %v110_v5  ;;  %v112_v8 = vld [vmem:[#allocation4 + $0x30] sm:$0xff]  ;;  %v113_v9 = vld [vmem:[#allocation4 + $0x38] sm:$0xff]  ;;  %v114_v11 = vld [vmem:[#allocation4 + $0x40] sm:$0xff] }
  0x44   :  { %1283 = vmatprep.subr.bf16.mxu1 %v1537_v0  ;;  %v1332_v10 = vpack.c.bf16 %v113_v9, %v112_v8  ;;  %v115_v12 = vld [vmem:[#allocation4 + $0x48] sm:$0xff]  ;;  %v116_v14 = vld [vmem:[#allocation4 + $0x50] sm:$0xff]  ;;  %v117_v16 = vld [vmem:[#allocation4 + $0x58] sm:$0xff] }
  0x45   :  { %1261 = vmatpush3.bf16.msra.mxu0 %v1260_v21  ;;  %v1335_v13 = vpack.c.bf16 %v115_v12, %v114_v11  ;;  %v1338_v17 = vpack.c.bf16 %v117_v16, %v116_v14  ;;  %v118_v19 = vld [vmem:[#allocation4 + $0x60] sm:$0xff]  ;;  %v119_v20 = vld [vmem:[#allocation4 + $0x68] sm:$0xff]  ;;  %v120_v22 = vld [vmem:[#allocation4 + $0x70] sm:$0xff] }
  0x46   :  { %1262 = vmatprep.subr.bf16.mxu0 %v1537_v0  ;;  %v1341_v21 = vpack.c.bf16 %v119_v20, %v118_v19  ;;  %v121_v23 = vld [vmem:[#allocation4 + $0x78] sm:$0xff]  ;;  %v449_v26 = vld [vmem:[#allocation2 + $0x80] sm:$0xff]  ;;  %v450_v27 = vld [vmem:[#allocation2 + $0x88] sm:$0xff] }
  0x47   :  { %1285 = vmatpush3.bf16.msra.mxu1 %v1677_v38  ;;  %v1347_v29 = vpack.c.bf16 %v450_v27, %v449_v26  ;;  %v452_v30 = vld [vmem:[#allocation2 + $0x98] sm:$0xff]  ;;  %v453_v32 = vld [vmem:[#allocation2 + $0xa0] sm:$0xff]  ;;  %v454_v33 = vld [vmem:[#allocation2 + $0xa8] sm:$0xff] }
  0x48   :  { %1286 = vmatprep.subr.bf16.mxu1 %v1537_v0  ;;  %v455_v56 = vld [vmem:[#allocation2 + $0xb0] sm:$0xff]  ;;  %v456_v57 = vld [vmem:[#allocation2 + $0xb8] sm:$0xff]  ;;  %v825_v9 = vld [vmem:[%s1815_s6] ss:$0 sm:$0xff] }
  0x49   :  { %1264 = vmatpush3.bf16.msra.mxu0 %v1263_v25  ;;  %v1344_v25 = vpack.c.bf16 %v121_v23, %v120_v22  ;;  %v460_v63 = vld [vmem:[#allocation2 + $0xd8] sm:$0xff]  ;;  %v463_v6 = vld [vmem:[#allocation2 + $0xf0] sm:$0xff] }
  0x4a   :  { %1265 = vmatprep.subr.bf16.mxu0 %v1537_v0  ;;  %v474_v26 = vld [vmem:[#allocation4 + $0x90] sm:$0xff]  ;;  %v475_v27 = vld [vmem:[#allocation4 + $0x98] sm:$0xff] }
  0x4b   :  { %1288 = vmatpush3.bf16.msra.mxu1 %v1683_v41 }
  0x4c   :  { %1289 = vmatprep.subr.bf16.mxu1 %v1537_v0 }
  0x4d   :  { %1267 = vmatpush3.bf16.msra.mxu0 %v1266_v28  ;;  %v451_v28 = vld [vmem:[#allocation2 + $0x90] sm:$0xff] }
  0x4e   :  { %1268 = vmatprep.subr.bf16.mxu0 %v1537_v0 }
  0x4f   :  { %1291 = vmatpush3.bf16.msra.mxu1 %v1689_v44 }
  0x50   :  { %1292 = vmatprep.subr.bf16.mxu1 %v1537_v0 }
  0x51   :  { %1270 = vmatpush3.bf16.msra.mxu0 %v1269_v31  ;;  %v1350_v31 = vpack.c.bf16 %v452_v30, %v451_v28  ;;  %v1422_v28 = vpack.c.bf16 %v475_v27, %v474_v26  ;;  %v477_v30 = vld [vmem:[#allocation4 + $0xa8] sm:$0xff] }
  0x52   :  { %1271 = vmatprep.subr.bf16.mxu0 %v1537_v0 }
  0x53   :  { %1294 = vmatpush3.bf16.msra.mxu1 %v1695_v47 }
  0x54   :  { %1295 = vmatprep.subr.bf16.mxu1 %v1537_v0 }
  0x55   :  { %1273 = vmatpush3.bf16.msra.mxu0 %v1272_v34  ;;  %v1353_v34 = vpack.c.bf16 %v454_v33, %v453_v32  ;;  %v478_v32 = vld [vmem:[#allocation4 + $0xb0] sm:$0xff]  ;;  %v479_v33 = vld [vmem:[#allocation4 + $0xb8] sm:$0xff] }
  0x56   :  { %1298 = vmatprep.subr.bf16.mxu0 %v1537_v0 }
  0x57   :  { %1297 = vmatpush3.bf16.msra.mxu1 %v1701_v50 }
  0x58   :  { %1003 = vmatmul.mubr.f32.vlgmr.msra.gmra.mrb[0].mxu0 %v1665_v35  ;;  %1322 = vmatprep.subr.bf16.mxu1 %v1537_v0 }
  0x59   :  { %1300 = vmatpush3.bf16.msra.mxu0 %v1644_v15  ;;  %1072 = vmatprep.mubr.msk.f32.mxu0 %vm1538_vm0, %v1539_v1 }
  0x5a   :  { %1301 = vmatprep.subr.bf16.mxu0 %v1537_v0 }
  0x5d   :  { %1303 = vmatpush3.bf16.msra.mxu0 %v1648_v18 }
  0x5e   :  { %1304 = vmatprep.subr.bf16.mxu0 %v1537_v0 }
  0x61   :  { %1306 = vmatpush3.bf16.msra.mxu0 %v1653_v24 }
  0x62   :  { %1307 = vmatprep.subr.bf16.mxu0 %v1537_v0 }
  0x65   :  { %1309 = vmatpush3.bf16.msra.mxu0 %v1677_v38 }
  0x66   :  { %1310 = vmatprep.subr.bf16.mxu0 %v1537_v0 }
  0x69   :  { %1312 = vmatpush3.bf16.msra.mxu0 %v1683_v41 }
  0x6a   :  { %1313 = vmatprep.subr.bf16.mxu0 %v1537_v0 }
  0x6d   :  { %1315 = vmatpush3.bf16.msra.mxu0 %v1689_v44 }
  0x6e   :  { %1316 = vmatprep.subr.bf16.mxu0 %v1537_v0 }
  0x71   :  { %1318 = vmatpush3.bf16.msra.mxu0 %v1695_v47 }
  0x72   :  { %1319 = vmatprep.subr.bf16.mxu0 %v1537_v0 }
  0x75   :  { %1321 = vmatpush3.bf16.msra.mxu0 %v1701_v50 }
  0x76   :  { %1346 = vmatprep.subr.bf16.mxu0 %v1537_v0 }
 0x12b   :  { %v195_v52 = vpop.f32.mrb[0].mxu0 }
 0x12c   :  { %v196_v53 = vadd.f32 %v822_v51, %v195_v52  ;;  %v1004_v54 = vpop.f32.mrb[1].mxu0  ;;  %v823_v51 = vld [vmem:[%s1812_s3] ss:$0 sm:$0xff] }
 0x12e   :  { %v200_v55 = vmul.f32 0.70710677, %v196_v53  ;;  %v199_v59 = vmul.f32 0.5, %v196_v53  ;;  %v824_v53 = vld [vmem:[%s1813_s4] ss:$0 sm:$0xff] }
 0x130   :  { %1450 = verf.f32 %v200_v55 }
 0x13a   :  { %v1451_v58 = vpop.eup %1450 }
 0x13b   :  { %v202_v60 = vadd.f32 1.0, %v1451_v58  ;;  %v1356_v58 = vpack.c.bf16 %v456_v57, %v455_v56 }
 0x13d   :  { %v1710_v62 = vmul.f32 %v202_v60, %v199_v59  ;;  %v457_v59 = vld [vmem:[#allocation2 + $0xc0] sm:$0xff]  ;;  %v458_v60 = vld [vmem:[#allocation2 + $0xc8] sm:$0xff] }
 0x13f   :  { %1038 = vmatmul.mubr.f32.vlgmr.msra.gmra.mrb[0].mxu1 %v1710_v62  ;;  %v274_v3 = vmul.f32 %v1710_v62, %v1710_v62 }
 0x140   :  { %1324 = vmatpush3.bf16.msra.mxu1 %v1323_v61  ;;  %1107 = vmatprep.mubr.msk.f32.mxu1 %vm1538_vm0, %v1539_v1  ;;  %v1359_v61 = vpack.c.bf16 %v458_v60, %v457_v59 }
 0x141   :  { %1073 = vmatmul.mubr.f32.vlgmr.msra.gmra.mrb[2].mxu0 %v274_v3  ;;  %1325 = vmatprep.subr.bf16.mxu1 %v1537_v0  ;;  %v461_v3 = vld [vmem:[#allocation2 + $0xe0] sm:$0xff] }
 0x142   :  { %1142 = vmatprep.mubr.msk.f32.mxu0 %vm1538_vm0, %v1539_v1  ;;  %1348 = vmatpush3.bf16.msra.mxu0 %v1347_v29  ;;  %v476_v29 = vld [vmem:[#allocation4 + $0xa0] sm:$0xff] }
 0x143   :  { %1349 = vmatprep.subr.bf16.mxu0 %v1537_v0 }
 0x144   :  { %1327 = vmatpush3.bf16.msra.mxu1 %v1326_v4  ;;  %v462_v4 = vld [vmem:[#allocation2 + $0xe8] sm:$0xff] }
 0x145   :  { %1328 = vmatprep.subr.bf16.mxu1 %v1537_v0  ;;  %v1365_v5 = vpack.c.bf16 %v462_v4, %v461_v3  ;;  %v833_v4 = vld [vmem:[%s1815_s6 + $0x1] ss:$0 sm:$0xff] }
 0x146   :  { %1351 = vmatpush3.bf16.msra.mxu0 %v1350_v31  ;;  %v1425_v31 = vpack.c.bf16 %v477_v30, %v476_v29 }
 0x147   :  { %1352 = vmatprep.subr.bf16.mxu0 %v1537_v0 }
 0x148   :  { %1330 = vmatpush3.bf16.msra.mxu1 %v1329_v7  ;;  %v464_v7 = vld [vmem:[#allocation2 + $0xf8] sm:$0xff] }
 0x149   :  { %1331 = vmatprep.subr.bf16.mxu1 %v1537_v0  ;;  %v1368_v8 = vpack.c.bf16 %v464_v7, %v463_v6 }
 0x14a   :  { %1354 = vmatpush3.bf16.msra.mxu0 %v1353_v34  ;;  %v1428_v34 = vpack.c.bf16 %v479_v33, %v478_v32 }
 0x14b   :  { %1355 = vmatprep.subr.bf16.mxu0 %v1537_v0 }
 0x14c   :  { %1333 = vmatpush3.bf16.msra.mxu1 %v1332_v10 }
 0x14d   :  { %1334 = vmatprep.subr.bf16.mxu1 %v1537_v0 }
 0x14e   :  { %1357 = vmatpush3.bf16.msra.mxu0 %v1356_v58 }
 0x14f   :  { %1358 = vmatprep.subr.bf16.mxu0 %v1537_v0 }
 0x150   :  { %1336 = vmatpush3.bf16.msra.mxu1 %v1335_v13 }
 0x151   :  { %1337 = vmatprep.subr.bf16.mxu1 %v1537_v0 }
 0x152   :  { %1360 = vmatpush3.bf16.msra.mxu0 %v1359_v61 }
 0x153   :  { %1361 = vmatprep.subr.bf16.mxu0 %v1537_v0 }
 0x154   :  { %1339 = vmatpush3.bf16.msra.mxu1 %v1338_v17 }
 0x155   :  { %1340 = vmatprep.subr.bf16.mxu1 %v1537_v0 }
 0x158   :  { %1342 = vmatpush3.bf16.msra.mxu1 %v1341_v21  ;;  %v473_v21 = vld [vmem:[#allocation4 + $0x88] sm:$0xff] }
 0x159   :  { %1343 = vmatprep.subr.bf16.mxu1 %v1537_v0 }
 0x15c   :  { %1345 = vmatpush3.bf16.msra.mxu1 %v1344_v25 }
 0x15d   :  { %1370 = vmatprep.subr.bf16.mxu1 %v1537_v0 }
 0x212   :  { %v270_v36 = vpop.f32.mrb[0].mxu1 }
 0x213   :  { %v345_v37 = vmul.f32 %v270_v36, %v270_v36  ;;  %v1039_v39 = vpop.f32.mrb[1].mxu1  ;;  %v348_v48 = vsub.f32 %v1710_v62, %v270_v36  ;;  %v459_v62 = vld [vmem:[#allocation2 + $0xd0] sm:$0xff]  ;;  %v480_v36 = vld [vmem:[#allocation4 + $0xc0] sm:$0xff] }
 0x214   :  { %v341_v40 = vpop.f32.mrb[2].mxu0  ;;  %v1362_v2 = vpack.c.bf16 %v460_v63, %v459_v62  ;;  %v482_v39 = vld [vmem:[#allocation4 + $0xd0] sm:$0xff]  ;;  %v831_v62 = vld [vmem:[%s1812_s3 + $0x1] ss:$0 sm:$0xff] }
 0x215   :  { %v346_v42 = vsub.f32 %v341_v40, %v345_v37  ;;  %v1074_v43 = vpop.f32.mrb[3].mxu0  ;;  %v483_v40 = vld [vmem:[#allocation4 + $0xd8] sm:$0xff] }
 0x216   :  { %1363 = vmatpush3.bf16.msra.mxu0 %v1362_v2  ;;  %v484_v43 = vld [vmem:[#allocation4 + $0xe0] sm:$0xff] }
 0x217   :  { %v347_v45 = vmax.f32 %v346_v42, 0.0  ;;  %1364 = vmatprep.subr.bf16.mxu0 %v1537_v0  ;;  %v1434_v42 = vpack.c.bf16 %v483_v40, %v482_v39 }
 0x219   :  { %v349_v46 = vadd.f32 1e-05, %v347_v45  ;;  %v485_v45 = vld [vmem:[#allocation4 + $0xe8] sm:$0xff] }
 0x21a   :  { %1366 = vmatpush3.bf16.msra.mxu0 %v1365_v5 }
 0x21b   :  { %1452 = vrsqrt.f32 %v349_v46  ;;  %1367 = vmatprep.subr.bf16.mxu0 %v1537_v0  ;;  %v1437_v46 = vpack.c.bf16 %v485_v45, %v484_v43 }
 0x21e   :  { %1369 = vmatpush3.bf16.msra.mxu0 %v1368_v8 }
 0x21f   :  { %1394 = vmatprep.subr.bf16.mxu0 %v1537_v0 }
 0x225   :  { %v1453_v49 = vpop.eup %1452 }
 0x226   :  { %v351_v52 = vmul.f32 %v1453_v49, %v348_v48  ;;  %v486_v48 = vld [vmem:[#allocation4 + $0xf0] sm:$0xff]  ;;  %v487_v49 = vld [vmem:[#allocation4 + $0xf8] sm:$0xff] }
 0x228   :  { %v358_v54 = vmul.f32 %v823_v51, %v351_v52  ;;  %v1440_v51 = vpack.c.bf16 %v487_v49, %v486_v48 }
 0x22a   :  { %v365_v55 = vadd.f32 %v824_v53, %v358_v54 }
 0x22c   :  { %1108 = vmatmul.mubr.f32.vlgmr.msra.gmra.mrb[2].mxu1 %v365_v55 }
 0x22d   :  { %1372 = vmatpush3.bf16.msra.mxu1 %v1644_v15  ;;  %1177 = vmatprep.mubr.msk.f32.mxu1 %vm1538_vm0, %v1539_v1 }
 0x22e   :  { %1373 = vmatprep.subr.bf16.mxu1 %v1537_v0 }
 0x231   :  { %1375 = vmatpush3.bf16.msra.mxu1 %v1648_v18 }
 0x232   :  { %1376 = vmatprep.subr.bf16.mxu1 %v1537_v0 }
 0x235   :  { %1378 = vmatpush3.bf16.msra.mxu1 %v1653_v24 }
 0x236   :  { %1379 = vmatprep.subr.bf16.mxu1 %v1537_v0 }
 0x239   :  { %1381 = vmatpush3.bf16.msra.mxu1 %v1677_v38 }
 0x23a   :  { %1382 = vmatprep.subr.bf16.mxu1 %v1537_v0 }
 0x23d   :  { %1384 = vmatpush3.bf16.msra.mxu1 %v1683_v41 }
 0x23e   :  { %1385 = vmatprep.subr.bf16.mxu1 %v1537_v0 }
 0x241   :  { %1387 = vmatpush3.bf16.msra.mxu1 %v1689_v44 }
 0x242   :  { %1388 = vmatprep.subr.bf16.mxu1 %v1537_v0 }
 0x245   :  { %1390 = vmatpush3.bf16.msra.mxu1 %v1695_v47 }
 0x246   :  { %1391 = vmatprep.subr.bf16.mxu1 %v1537_v0 }
 0x249   :  { %1393 = vmatpush3.bf16.msra.mxu1 %v1701_v50 }
 0x24a   :  { %1418 = vmatprep.subr.bf16.mxu1 %v1537_v0 }
 0x2ff   :  { %v438_v10 = vpop.f32.mrb[2].mxu1 }
 0x300   :  { %v439_v11 = vadd.f32 %v825_v9, %v438_v10  ;;  %v1109_v12 = vpop.f32.mrb[3].mxu1 }
 0x302   :  { %v443_v13 = vmul.f32 0.70710677, %v439_v11  ;;  %v442_v16 = vmul.f32 0.5, %v439_v11 }
 0x304   :  { %1454 = verf.f32 %v443_v13 }
 0x30e   :  { %v1455_v14 = vpop.eup %1454 }
 0x30f   :  { %v445_v17 = vadd.f32 1.0, %v1455_v14 }
 0x311   :  { %v446_v19 = vmul.f32 %v445_v17, %v442_v16 }
 0x313   :  { %v1764_v20 = vadd.f32 %v446_v19, %v1665_v35 }
 0x315   :  { %1143 = vmatmul.mubr.f32.vlgmr.msra.gmra.mrb[4].mxu0 %v1764_v20 }
 0x316   :  { %1396 = vmatpush3.bf16.msra.mxu0 %v1644_v15  ;;  %1212 = vmatprep.mubr.msk.f32.mxu0 %vm1538_vm0, %v1539_v1  ;;  %v830_v15 = vld [vmem:[%s1811_s2 + $0x1] ss:$0 sm:$0xff] }
 0x317   :  { %1397 = vmatprep.subr.bf16.mxu0 %v1537_v0 }
 0x31a   :  { %1399 = vmatpush3.bf16.msra.mxu0 %v1648_v18 }
 0x31b   :  { %1400 = vmatprep.subr.bf16.mxu0 %v1537_v0 }
 0x31e   :  { %1402 = vmatpush3.bf16.msra.mxu0 %v1653_v24 }
 0x31f   :  { %1403 = vmatprep.subr.bf16.mxu0 %v1537_v0 }
 0x322   :  { %1405 = vmatpush3.bf16.msra.mxu0 %v1677_v38 }
 0x323   :  { %1406 = vmatprep.subr.bf16.mxu0 %v1537_v0 }
 0x326   :  { %1408 = vmatpush3.bf16.msra.mxu0 %v1683_v41  ;;  %v472_v41 = vld [vmem:[#allocation4 + $0x80] sm:$0xff] }
 0x327   :  { %1409 = vmatprep.subr.bf16.mxu0 %v1537_v0  ;;  %v1419_v25 = vpack.c.bf16 %v473_v21, %v472_v41 }
 0x32a   :  { %1411 = vmatpush3.bf16.msra.mxu0 %v1689_v44 }
 0x32b   :  { %1412 = vmatprep.subr.bf16.mxu0 %v1537_v0 }
 0x32e   :  { %1414 = vmatpush3.bf16.msra.mxu0 %v1695_v47 }
 0x32f   :  { %1415 = vmatprep.subr.bf16.mxu0 %v1537_v0 }
 0x332   :  { %1417 = vmatpush3.bf16.msra.mxu0 %v1701_v50 }
 0x3e8   :  { %v562_v18 = vpop.f32.mrb[4].mxu0 }
 0x3e9   :  { %v563_v24 = vadd.f32 %v830_v15, %v562_v18  ;;  %v1144_v35 = vpop.f32.mrb[5].mxu0 }
 0x3eb   :  { %v567_v38 = vmul.f32 0.70710677, %v563_v24  ;;  %v566_v22 = vmul.f32 0.5, %v563_v24 }
 0x3ed   :  { %1456 = verf.f32 %v567_v38 }
 0x3f7   :  { %v1457_v44 = vpop.eup %1456 }
 0x3f8   :  { %v569_v23 = vadd.f32 1.0, %v1457_v44 }
 0x3fa   :  { %v570_v47 = vmul.f32 %v569_v23, %v566_v22 }
 0x3fc   :  { %1178 = vmatmul.mubr.f32.vlgmr.msra.gmra.mrb[4].mxu1 %v570_v47  ;;  %v641_v50 = vmul.f32 %v570_v47, %v570_v47 }
 0x3fd   :  { %1420 = vmatpush3.bf16.msra.mxu1 %v1419_v25  ;;  %1247 = vmatprep.mubr.msk.f32.mxu1 %vm1538_vm0, %v1539_v1  ;;  %v481_v1 = vld [vmem:[#allocation4 + $0xc8] sm:$0xff] }
 0x3fe   :  { %1213 = vmatmul.mubr.f32.vlgmr.msra.gmra.mrb[6].mxu0 %v641_v50  ;;  %1421 = vmatprep.subr.bf16.mxu1 %v1537_v0  ;;  %v1431_v37 = vpack.c.bf16 %v481_v1, %v480_v36 }
 0x401   :  { %1423 = vmatpush3.bf16.msra.mxu1 %v1422_v28 }
 0x402   :  { %1424 = vmatprep.subr.bf16.mxu1 %v1537_v0 }
 0x405   :  { %1426 = vmatpush3.bf16.msra.mxu1 %v1425_v31 }
 0x406   :  { %1427 = vmatprep.subr.bf16.mxu1 %v1537_v0 }
 0x409   :  { %1429 = vmatpush3.bf16.msra.mxu1 %v1428_v34 }
 0x40a   :  { %1430 = vmatprep.subr.bf16.mxu1 %v1537_v0 }
 0x40d   :  { %1432 = vmatpush3.bf16.msra.mxu1 %v1431_v37 }
 0x40e   :  { %1433 = vmatprep.subr.bf16.mxu1 %v1537_v0 }
 0x411   :  { %1435 = vmatpush3.bf16.msra.mxu1 %v1434_v42 }
 0x412   :  { %1436 = vmatprep.subr.bf16.mxu1 %v1537_v0 }
 0x415   :  { %1438 = vmatpush3.bf16.msra.mxu1 %v1437_v46 }
 0x416   :  { %1439 = vmatprep.subr.bf16.mxu1 %v1537_v0  ;;  %v832_v0 = vld [vmem:[%s1813_s4 + $0x1] ss:$0 sm:$0xff] }
 0x419   :  { %1441 = vmatpush3.bf16.msra.mxu1 %v1440_v51 }
 0x4cf   :  { %v637_v52 = vpop.f32.mrb[4].mxu1 }
 0x4d0   :  { %v712_v53 = vmul.f32 %v637_v52, %v637_v52  ;;  %v1179_v54 = vpop.f32.mrb[5].mxu1  ;;  %v715_v60 = vsub.f32 %v570_v47, %v637_v52 }
 0x4d1   :  { %v708_v55 = vpop.f32.mrb[6].mxu0 }
 0x4d2   :  { %v713_v56 = vsub.f32 %v708_v55, %v712_v53  ;;  %v1214_v57 = vpop.f32.mrb[7].mxu0 }
 0x4d4   :  { %v714_v58 = vmax.f32 %v713_v56, 0.0 }
 0x4d6   :  { %v716_v59 = vadd.f32 1e-05, %v714_v58 }
 0x4d8   :  { %1458 = vrsqrt.f32 %v716_v59 }
 0x4e2   :  { %v1459_v61 = vpop.eup %1458 }
 0x4e3   :  { %v718_v63 = vmul.f32 %v1459_v61, %v715_v60 }
 0x4e5   :  { %v725_v2 = vmul.f32 %v831_v62, %v718_v63 }
 0x4e7   :  { %v732_v3 = vadd.f32 %v832_v0, %v725_v2 }
 0x4e9   :  { %1248 = vmatmul.mubr.f32.vlgmr.msra.gmra.mrb[6].mxu1 %v732_v3 }
 0x5bc   :  { %v805_v5 = vpop.f32.mrb[6].mxu1 }
 0x5bd   :  { %v806_v6 = vadd.f32 %v833_v4, %v805_v5  ;;  %v1249_v7 = vpop.f32.mrb[7].mxu1 }
 0x5bf   :  { %v810_v8 = vmul.f32 0.70710677, %v806_v6  ;;  %v809_v10 = vmul.f32 0.5, %v806_v6 }
 0x5c1   :  { %1460 = verf.f32 %v810_v8 }
 0x5cb   :  { %v1461_v9 = vpop.eup %1460 }
 0x5cc   :  { %v812_v11 = vadd.f32 1.0, %v1461_v9 }
 0x5ce   :  { %v813_v12 = vmul.f32 %v812_v11, %v809_v10 }
 0x5d0   :  { %v814_v13 = vadd.f32 %v813_v12, %v1764_v20 }
 0x5d2   :  { %815 = vst [vmem:[%s1817_s8] sm:$0xff] %v814_v13 }
 0x5d3   :  { %820 = vsyncpa [#allocation3], 1 }
 0x5d4   :  { %821 = vsyncpa [#allocation5], 1 }

</bundles_post_ra>
